<compile_context>
chip_gen: v5e
topology: v5e:2x2
jax: 0.10.0
libtpu: 0.0.40
codegen_flags: <defaults>
</compile_context>

<pallas_src>
import jax
import jax.numpy as jnp
import numpy as np
from jax.experimental import pallas as pl
from jax.experimental.pallas import tpu as pltpu


# ----------------------------- Pallas kernel --------------------------------
def _qlinear_kernel(x_ref, widx_ref, wtab_ref, bias_ref, o_ref, acc_ref):
    # x_ref:    (tm, tk) f32   activation tile
    # widx_ref: (tk, tn) int8  weight centroid indices, (K, N) layout
    # wtab_ref: (Cw,)    f32   weight centroid table (SMEM, scalar reads)
    # bias_ref: (1, tn)  f32   dequantized bias tile
    # o_ref:    (tm, tn) f32   output tile
    # acc_ref:  (tm, tn) f32   VMEM accumulator (resident across K grid axis)
    k = pl.program_id(2)

    @pl.when(k == 0)
    def _init():
        acc_ref[...] = jnp.zeros_like(acc_ref)

    # ---- dequantize weight tile: W[kk, n] = wtab[widx[kk, n]] ----
    # Unrolled select chain over the (small) centroid table; fully packed
    # vregs, VPU-only, no Cw-times memory blow-up.
    widx = widx_ref[...].astype(jnp.int32)                 # (tk, tn)
    n_centroids = wtab_ref.shape[0]                        # static (Cw)
    w = jnp.zeros(widx.shape, dtype=jnp.float32)
    for c in range(n_centroids):                           # unrolled at trace time
        w = jnp.where(widx == c, wtab_ref[c], w)

    # ---- matmul on the MXU: bf16 inputs, f32 accumulation ----
    acc_ref[...] += jnp.dot(
        x_ref[...].astype(jnp.bfloat16),
        w.astype(jnp.bfloat16),
        preferred_element_type=jnp.float32,
    )

    @pl.when(k == pl.num_programs(2) - 1)
    def _finalize():
        o_ref[...] = (acc_ref[...] + bias_ref[...]).astype(o_ref.dtype)


def _round_up(a, b):
    return (a + b - 1) // b * b


def quantized_linear(x, weight_idx, weight_table, bias_idx, bias_table,
                     *, tm=None, tn=128, tk=128):
    """out = x @ dequant(W).T + dequant(b), with table-quantized W and b.

    x:            (M, K) f32
    weight_idx:   (N, K) int   indices into weight_table (nn.Linear layout)
    weight_table: (Cw,)  f32   weight centroids
    bias_idx:     (N,)   int   indices into bias_table
    bias_table:   (Cb,)  f32   bias centroids
    """
    M, K = x.shape
    N = weight_idx.shape[0]
    Cw = weight_table.shape[0]

    # --- one-time layout prep (wrapper side, not per-grid-step compute) ---
    # (K, N) int8 indices: lane-dense dequant output, 4x less HBM than int32.
    widx_kn = jnp.asarray(weight_idx, dtype=jnp.int8).T            # (K, N)
    # TODO(synk): bias dequant is an N-element gather; hoisted to plain JAX per
    # perf guidance (negligible vs. the matmul, avoids Cb*N compares per step).
    bias = jnp.take(jnp.asarray(bias_table, jnp.float32),
                    jnp.asarray(bias_idx, jnp.int32))               # (N,)

    if tm is None:
        tm = min(_round_up(M, 8), 256)

    Mp, Kp, Np = _round_up(M, tm), _round_up(K, tk), _round_up(N, tn)
    x_p = jnp.pad(x.astype(jnp.float32), ((0, Mp - M), (0, Kp - K)))
    widx_p = jnp.pad(widx_kn, ((0, Kp - K), (0, Np - N)))           # pad idx 0 (x pad is 0)
    bias_p = jnp.pad(bias, (0, Np - N)).reshape(1, Np)
    wtab = jnp.asarray(weight_table, jnp.float32)

    grid = (Mp // tm, Np // tn, Kp // tk)

    cost = pl.CostEstimate(
        flops=2 * Mp * Np * Kp,
        transcendentals=0,
        bytes_accessed=(x_p.size * 4 + widx_p.size * 1 + bias_p.size * 4
                        + Mp * Np * 4 + Cw * 4),
    )

    out = pl.pallas_call(
        _qlinear_kernel,
        out_shape=jax.ShapeDtypeStruct((Mp, Np), jnp.float32),
        grid_spec=pltpu.PrefetchScalarGridSpec(
            num_scalar_prefetch=0,
            grid=grid,
            in_specs=[
                pl.BlockSpec((tm, tk), lambda i, j, k: (i, k)),          # x tile
                pl.BlockSpec((tk, tn), lambda i, j, k: (k, j)),          # weight idx tile
                pl.BlockSpec(memory_space=pltpu.MemorySpace.SMEM),       # centroid table
                pl.BlockSpec((1, tn), lambda i, j, k: (0, j)),           # bias tile
            ],
            out_specs=pl.BlockSpec((tm, tn), lambda i, j, k: (i, j)),
            scratch_shapes=[pltpu.VMEM((tm, tn), jnp.float32)],
        ),
        compiler_params=pltpu.CompilerParams(
            dimension_semantics=("parallel", "parallel", "arbitrary"),
            vmem_limit_bytes=48 * 1024 * 1024,
        ),
        cost_estimate=cost,
    )(x_p, widx_p, wtab, bias_p)

    return out[:M, :N]


# --------------- host-side synthetic quantization (mirrors __init__) --------
def _linear_init_centroids(w_flat, n_clusters):
    # same rule as QuantizedLayer.init_centroid_weights(init_method='linear')
    min_w, max_w = float(np.min(w_flat)) * 10.0, float(np.max(w_flat)) * 10.0
    spacing = (max_w - min_w) / (n_clusters + 1)
    return np.linspace(min_w + spacing, max_w - spacing, n_clusters) / 10.0


def _quantize(params, n_clusters):
    # TODO(synk): sklearn MiniBatchKMeans refinement is offline preprocessing;
    # linear-init centroids + nearest-centroid assignment reproduce the
    # (index tensor, centroid table) structure that forward() consumes.
    flat = np.asarray(params).reshape(-1)
    centroids = _linear_init_centroids(flat, n_clusters).astype(np.float32)
    idx = np.argmin(np.abs(flat[:, None] - centroids[None, :]), axis=1)
    assert int(idx.max()) < n_clusters and int(idx.min()) >= 0
    return idx.astype(np.int32).reshape(params.shape), centroids


if __name__ == "__main__":
    M, K, N = 8, 256, 192        # batch, in_features, out_features
    Cw, Cb = 16, 256             # n_clusters for weights / bias (2**4, 2**8)

    key = jax.random.PRNGKey(0)
    kx, kw, kb = jax.random.split(key, 3)
    x = jax.random.normal(kx, (M, K), dtype=jnp.float32)
    w_orig = np.asarray(jax.random.normal(kw, (N, K), dtype=jnp.float32))
    b_orig = np.asarray(jax.random.normal(kb, (N,), dtype=jnp.float32))

    w_idx_np, w_tab_np = _quantize(w_orig, Cw)     # (N, K) idx, (Cw,) table
    b_idx_np, b_tab_np = _quantize(b_orig, Cb)     # (N,)   idx, (Cb,) table

    out = quantized_linear(
        x,
        jnp.asarray(w_idx_np),                     # (N, K) indices (module layout)
        jnp.asarray(w_tab_np),                     # (Cw,)
        jnp.asarray(b_idx_np),                     # (N,)
        jnp.asarray(b_tab_np),                     # (Cb,)
    )
    out = jax.block_until_ready(out)

    # reference: exact module semantics (f32 gather + F.linear)
    W_ref = w_tab_np[w_idx_np]                     # (N, K)
    b_ref = b_tab_np[b_idx_np]                     # (N,)
    ref = np.asarray(x) @ W_ref.T + b_ref[None, :]

    # kernel uses bf16 MXU inputs with f32 accumulation -> loosened tolerance
    assert np.allclose(np.asarray(out), ref, rtol=2e-2, atol=2e-1), (
        "mismatch vs reference, max abs err = %f"
        % float(np.max(np.abs(np.asarray(out) - ref))))

    print("KERNEL_OK")
</pallas_src>

<mosaic_0001>
module attributes {stable_mosaic.version = 11 : i64} {
  func.func @_qlinear_kernel(%arg0: i32, %arg1: i32, %arg2: i32, %arg3: memref<8x128xf32, #tpu.memory_space<vmem>>, %arg4: memref<128x128xi8, #tpu.memory_space<vmem>>, %arg5: memref<16xf32, #tpu.memory_space<smem>>, %arg6: memref<1x128xf32, #tpu.memory_space<vmem>>, %arg7: memref<8x128xf32, #tpu.memory_space<vmem>>, %arg8: memref<8x128xf32, #tpu.memory_space<vmem>>) attributes {dimension_semantics = [#tpu.dimension_semantics<parallel>, #tpu.dimension_semantics<parallel>, #tpu.dimension_semantics<arbitrary>], iteration_bounds = array<i64: 1, 2, 2>, scalar_prefetch = 0 : i64, scratch_operands = 1 : i64, tpu.core_type = #tpu.core_type<tc>, window_params = [{transform_indices = @transform_0, window_bounds = array<i64: 8, 128>}, {transform_indices = @transform_1, window_bounds = array<i64: 128, 128>}, {transform_indices = @transform_2, window_bounds = array<i64: 16>}, {transform_indices = @transform_3, window_bounds = array<i64: 1, 128>}, {transform_indices = @transform_4, window_bounds = array<i64: 8, 128>}]} {
    %c0_i32 = arith.constant 0 : i32
    %0 = arith.cmpi eq, %arg2, %c0_i32 : i32
    %1 = arith.extui %0 : i1 to i32
    %c0_i32_0 = arith.constant 0 : i32
    %2 = arith.cmpi ne, %1, %c0_i32_0 : i32
    scf.if %2 {
      %cst_13 = arith.constant 0.000000e+00 : f32
      %96 = vector.broadcast %cst_13 : f32 to vector<8x128xf32>
      %c0_14 = arith.constant 0 : index
      %c0_15 = arith.constant 0 : index
      %97 = vector.load %arg8[%c0_14, %c0_15] : memref<8x128xf32, #tpu.memory_space<vmem>>, vector<8x128xf32>
      tpu.vector_store %arg8[%c0_14, %c0_15], %96 {strides = array<i32>} : memref<8x128xf32, #tpu.memory_space<vmem>>, vector<8x128xf32>,
    } else {
    }
    %c0 = arith.constant 0 : index
    %c0_1 = arith.constant 0 : index
    %3 = vector.load %arg4[%c0, %c0_1] : memref<128x128xi8, #tpu.memory_space<vmem>>, vector<128x128xi8>
    %4 = arith.extsi %3 : vector<128x128xi8> to vector<128x128xi32>
    %cst = arith.constant 0.000000e+00 : f32
    %5 = vector.broadcast %cst : f32 to vector<128x128xf32>
    %c0_i32_2 = arith.constant 0 : i32
    %6 = vector.broadcast %c0_i32_2 : i32 to vector<128x128xi32>
    %7 = arith.cmpi eq, %4, %6 : vector<128x128xi32>
    %c0_3 = arith.constant 0 : index
    %8 = memref.load %arg5[%c0_3] : memref<16xf32, #tpu.memory_space<smem>>
    %9 = vector.broadcast %8 : f32 to vector<128x128xf32>
    %10 = arith.select %7, %9, %5 : vector<128x128xi1>, vector<128x128xf32>
    %c1_i32 = arith.constant 1 : i32
    %11 = vector.broadcast %c1_i32 : i32 to vector<128x128xi32>
    %12 = arith.cmpi eq, %4, %11 : vector<128x128xi32>
    %c1 = arith.constant 1 : index
    %13 = memref.load %arg5[%c1] : memref<16xf32, #tpu.memory_space<smem>>
    %14 = vector.broadcast %13 : f32 to vector<128x128xf32>
    %15 = arith.select %12, %14, %10 : vector<128x128xi1>, vector<128x128xf32>
    %c2_i32 = arith.constant 2 : i32
    %16 = vector.broadcast %c2_i32 : i32 to vector<128x128xi32>
    %17 = arith.cmpi eq, %4, %16 : vector<128x128xi32>
    %c2 = arith.constant 2 : index
    %18 = memref.load %arg5[%c2] : memref<16xf32, #tpu.memory_space<smem>>
    %19 = vector.broadcast %18 : f32 to vector<128x128xf32>
    %20 = arith.select %17, %19, %15 : vector<128x128xi1>, vector<128x128xf32>
    %c3_i32 = arith.constant 3 : i32
    %21 = vector.broadcast %c3_i32 : i32 to vector<128x128xi32>
    %22 = arith.cmpi eq, %4, %21 : vector<128x128xi32>
    %c3 = arith.constant 3 : index
    %23 = memref.load %arg5[%c3] : memref<16xf32, #tpu.memory_space<smem>>
    %24 = vector.broadcast %23 : f32 to vector<128x128xf32>
    %25 = arith.select %22, %24, %20 : vector<128x128xi1>, vector<128x128xf32>
    %c4_i32 = arith.constant 4 : i32
    %26 = vector.broadcast %c4_i32 : i32 to vector<128x128xi32>
    %27 = arith.cmpi eq, %4, %26 : vector<128x128xi32>
    %c4 = arith.constant 4 : index
    %28 = memref.load %arg5[%c4] : memref<16xf32, #tpu.memory_space<smem>>
    %29 = vector.broadcast %28 : f32 to vector<128x128xf32>
    %30 = arith.select %27, %29, %25 : vector<128x128xi1>, vector<128x128xf32>
    %c5_i32 = arith.constant 5 : i32
    %31 = vector.broadcast %c5_i32 : i32 to vector<128x128xi32>
    %32 = arith.cmpi eq, %4, %31 : vector<128x128xi32>
    %c5 = arith.constant 5 : index
    %33 = memref.load %arg5[%c5] : memref<16xf32, #tpu.memory_space<smem>>
    %34 = vector.broadcast %33 : f32 to vector<128x128xf32>
    %35 = arith.select %32, %34, %30 : vector<128x128xi1>, vector<128x128xf32>
    %c6_i32 = arith.constant 6 : i32
    %36 = vector.broadcast %c6_i32 : i32 to vector<128x128xi32>
    %37 = arith.cmpi eq, %4, %36 : vector<128x128xi32>
    %c6 = arith.constant 6 : index
    %38 = memref.load %arg5[%c6] : memref<16xf32, #tpu.memory_space<smem>>
    %39 = vector.broadcast %38 : f32 to vector<128x128xf32>
    %40 = arith.select %37, %39, %35 : vector<128x128xi1>, vector<128x128xf32>
    %c7_i32 = arith.constant 7 : i32
    %41 = vector.broadcast %c7_i32 : i32 to vector<128x128xi32>
    %42 = arith.cmpi eq, %4, %41 : vector<128x128xi32>
    %c7 = arith.constant 7 : index
    %43 = memref.load %arg5[%c7] : memref<16xf32, #tpu.memory_space<smem>>
    %44 = vector.broadcast %43 : f32 to vector<128x128xf32>
    %45 = arith.select %42, %44, %40 : vector<128x128xi1>, vector<128x128xf32>
    %c8_i32 = arith.constant 8 : i32
    %46 = vector.broadcast %c8_i32 : i32 to vector<128x128xi32>
    %47 = arith.cmpi eq, %4, %46 : vector<128x128xi32>
    %c8 = arith.constant 8 : index
    %48 = memref.load %arg5[%c8] : memref<16xf32, #tpu.memory_space<smem>>
    %49 = vector.broadcast %48 : f32 to vector<128x128xf32>
    %50 = arith.select %47, %49, %45 : vector<128x128xi1>, vector<128x128xf32>
    %c9_i32 = arith.constant 9 : i32
    %51 = vector.broadcast %c9_i32 : i32 to vector<128x128xi32>
    %52 = arith.cmpi eq, %4, %51 : vector<128x128xi32>
    %c9 = arith.constant 9 : index
    %53 = memref.load %arg5[%c9] : memref<16xf32, #tpu.memory_space<smem>>
    %54 = vector.broadcast %53 : f32 to vector<128x128xf32>
    %55 = arith.select %52, %54, %50 : vector<128x128xi1>, vector<128x128xf32>
    %c10_i32 = arith.constant 10 : i32
    %56 = vector.broadcast %c10_i32 : i32 to vector<128x128xi32>
    %57 = arith.cmpi eq, %4, %56 : vector<128x128xi32>
    %c10 = arith.constant 10 : index
    %58 = memref.load %arg5[%c10] : memref<16xf32, #tpu.memory_space<smem>>
    %59 = vector.broadcast %58 : f32 to vector<128x128xf32>
    %60 = arith.select %57, %59, %55 : vector<128x128xi1>, vector<128x128xf32>
    %c11_i32 = arith.constant 11 : i32
    %61 = vector.broadcast %c11_i32 : i32 to vector<128x128xi32>
    %62 = arith.cmpi eq, %4, %61 : vector<128x128xi32>
    %c11 = arith.constant 11 : index
    %63 = memref.load %arg5[%c11] : memref<16xf32, #tpu.memory_space<smem>>
    %64 = vector.broadcast %63 : f32 to vector<128x128xf32>
    %65 = arith.select %62, %64, %60 : vector<128x128xi1>, vector<128x128xf32>
    %c12_i32 = arith.constant 12 : i32
    %66 = vector.broadcast %c12_i32 : i32 to vector<128x128xi32>
    %67 = arith.cmpi eq, %4, %66 : vector<128x128xi32>
    %c12 = arith.constant 12 : index
    %68 = memref.load %arg5[%c12] : memref<16xf32, #tpu.memory_space<smem>>
    %69 = vector.broadcast %68 : f32 to vector<128x128xf32>
    %70 = arith.select %67, %69, %65 : vector<128x128xi1>, vector<128x128xf32>
    %c13_i32 = arith.constant 13 : i32
    %71 = vector.broadcast %c13_i32 : i32 to vector<128x128xi32>
    %72 = arith.cmpi eq, %4, %71 : vector<128x128xi32>
    %c13 = arith.constant 13 : index
    %73 = memref.load %arg5[%c13] : memref<16xf32, #tpu.memory_space<smem>>
    %74 = vector.broadcast %73 : f32 to vector<128x128xf32>
    %75 = arith.select %72, %74, %70 : vector<128x128xi1>, vector<128x128xf32>
    %c14_i32 = arith.constant 14 : i32
    %76 = vector.broadcast %c14_i32 : i32 to vector<128x128xi32>
    %77 = arith.cmpi eq, %4, %76 : vector<128x128xi32>
    %c14 = arith.constant 14 : index
    %78 = memref.load %arg5[%c14] : memref<16xf32, #tpu.memory_space<smem>>
    %79 = vector.broadcast %78 : f32 to vector<128x128xf32>
    %80 = arith.select %77, %79, %75 : vector<128x128xi1>, vector<128x128xf32>
    %c15_i32 = arith.constant 15 : i32
    %81 = vector.broadcast %c15_i32 : i32 to vector<128x128xi32>
    %82 = arith.cmpi eq, %4, %81 : vector<128x128xi32>
    %c15 = arith.constant 15 : index
    %83 = memref.load %arg5[%c15] : memref<16xf32, #tpu.memory_space<smem>>
    %84 = vector.broadcast %83 : f32 to vector<128x128xf32>
    %85 = arith.select %82, %84, %80 : vector<128x128xi1>, vector<128x128xf32>
    %c0_4 = arith.constant 0 : index
    %c0_5 = arith.constant 0 : index
    %86 = vector.load %arg8[%c0_4, %c0_5] : memref<8x128xf32, #tpu.memory_space<vmem>>, vector<8x128xf32>
    %c0_6 = arith.constant 0 : index
    %c0_7 = arith.constant 0 : index
    %87 = vector.load %arg3[%c0_6, %c0_7] : memref<8x128xf32, #tpu.memory_space<vmem>>, vector<8x128xf32>
    %88 = arith.truncf %87 : vector<8x128xf32> to vector<8x128xbf16>
    %89 = arith.truncf %85 : vector<128x128xf32> to vector<128x128xbf16>
    %cst_8 = arith.constant dense<0.000000e+00> : vector<8x128xf32>
    %90 = tpu.matmul %88, %89, %cst_8 {dimension_numbers = #tpu.dot_dimension_numbers<[1], [0], [0], [1], [0, 0, 1, 1], [], []>} : vector<8x128xbf16>, vector<128x128xbf16>, vector<8x128xf32> -> vector<8x128xf32>
    %91 = arith.addf %86, %90 : vector<8x128xf32>
    %c0_9 = arith.constant 0 : index
    %c0_10 = arith.constant 0 : index
    %92 = vector.load %arg8[%c0_9, %c0_10] : memref<8x128xf32, #tpu.memory_space<vmem>>, vector<8x128xf32>
    tpu.vector_store %arg8[%c0_9, %c0_10], %91 {strides = array<i32>} : memref<8x128xf32, #tpu.memory_space<vmem>>, vector<8x128xf32>,
    %c1_i32_11 = arith.constant 1 : i32
    %93 = arith.cmpi eq, %arg2, %c1_i32_11 : i32
    %94 = arith.extui %93 : i1 to i32
    %c0_i32_12 = arith.constant 0 : i32
    %95 = arith.cmpi ne, %94, %c0_i32_12 : i32
    scf.if %95 {
      %c0_13 = arith.constant 0 : index
      %c0_14 = arith.constant 0 : index
      %96 = vector.load %arg8[%c0_13, %c0_14] : memref<8x128xf32, #tpu.memory_space<vmem>>, vector<8x128xf32>
      %c0_15 = arith.constant 0 : index
      %c0_16 = arith.constant 0 : index
      %97 = vector.load %arg6[%c0_15, %c0_16] : memref<1x128xf32, #tpu.memory_space<vmem>>, vector<1x128xf32>
      %98 = vector.broadcast %97 : vector<1x128xf32> to vector<8x128xf32>
      %99 = arith.addf %96, %98 : vector<8x128xf32>
      %c0_17 = arith.constant 0 : index
      %c0_18 = arith.constant 0 : index
      %100 = vector.load %arg7[%c0_17, %c0_18] : memref<8x128xf32, #tpu.memory_space<vmem>>, vector<8x128xf32>
      tpu.vector_store %arg7[%c0_17, %c0_18], %99 {strides = array<i32>} : memref<8x128xf32, #tpu.memory_space<vmem>>, vector<8x128xf32>,
    } else {
    }
    return
  }
  func.func @transform_0(%arg0: i32, %arg1: i32, %arg2: i32) -> (i32, i32) {
    %c0_i32 = arith.constant 0 : i32
    return %arg0, %arg2 : i32, i32
  }
  func.func @transform_1(%arg0: i32, %arg1: i32, %arg2: i32) -> (i32, i32) {
    %c0_i32 = arith.constant 0 : i32
    return %arg2, %arg1 : i32, i32
  }
  func.func @transform_2(%arg0: i32, %arg1: i32, %arg2: i32) -> i32 {
    %c0_i32 = arith.constant 0 : i32
    %c0_i32_0 = arith.constant 0 : i32
    return %c0_i32 : i32
  }
  func.func @transform_3(%arg0: i32, %arg1: i32, %arg2: i32) -> (i32, i32) {
    %c0_i32 = arith.constant 0 : i32
    %c0_i32_0 = arith.constant 0 : i32
    return %c0_i32, %arg1 : i32, i32
  }
  func.func @transform_4(%arg0: i32, %arg1: i32, %arg2: i32) -> (i32, i32) {
    %c0_i32 = arith.constant 0 : i32
    return %arg0, %arg1 : i32, i32
  }
}

</mosaic_0001>

<bundles_post_ra>
// kernel: tpu_custom_call.1
= control target key start
LH: loop header
LB: loop body
LE: loop exit
PB: predicated region body
PF: predicated region fallthrough
CT: control target
= control target key end

     0   :  { %s2449_s0 = inlined_call_operand.hbm [shape: f32[8,256], index: 0, kind: input, shape index: {}]   ;;  %s2450_s1 = inlined_call_operand.hbm [shape: s8[256,256], index: 1, kind: input, shape index: {}]   ;;  %s2451_s2 = inlined_call_operand.hbm [shape: f32[16], index: 2, kind: input, shape index: {}]   ;;  %s2452_s3 = inlined_call_operand.vmem [shape: f32[1,256], index: 3, kind: input, shape index: {}]   ;;  %s2453_s4 = inlined_call_operand.hbm [shape: f32[8,256], index: 4, kind: output, shape index: {}]  }
   0x1   :  { %2464 = sst [smem:[#allocation27_spill]] %s2449_s0 }
   0x2   :  { %2465 = sst [smem:[#allocation28_spill]] %s2451_s2 }
   0x3   :  { %2466 = sst [smem:[#allocation29_spill]] %s2452_s3 }
   0x4   :  { %2467 = sst [smem:[#allocation30_spill]] %s2453_s4 }
   0x5   :  { %9 = vsyncpa [#allocation4], 0 }
   0x6   :  { %11 = vsyncpa [#allocation4 + $0x1], 0 }
   0x7   :  { %12 = vsyncpa [#allocation8], 0 }
   0x8   :  { %14 = vsyncpa [#allocation8 + $0x1], 0 }
   0x9   :  { %15 = vsyncpa [#allocation6], 0 }
   0xa   :  { %16 = vsyncpa [#allocation5], 0 }
   0xb   :  { %18 = vsyncpa [#allocation5 + $0x1], 0  ;;  %s1519_s15 = smov 0   ;;  %s1521_s16 = smov 0  }
   0xc   :  { %s1523_s17 = smov 0   ;;  %s1525_s18 = smov 0  }
   0xd   :  { %s1527_s19 = smov 0   ;;  %s1529_s20 = smov 0  }
   0xe   :  { %s1531_s21 = smov 0   ;;  %s1533_s22 = smov 0  }
   0xf   :  { %s1535_s23 = smov 0   ;;  %s1537_s24 = smov 0  }
  0x10   :  { %s1539_s25 = smov 0   ;;  %s1541_s26 = smov 0  }
  0x11   :  { %s1543_s27 = smov 0   ;;  %s1545_s28 = smov 0  }
  0x12 LB: > { %2468 = sst [smem:[#allocation15_spill]] %s1435_s15  ;;  %s1073_s29 = sadd.s32 4294967295, %s1487_s28   ;;  %s1487_s28 = sphi %s1545_s28, %s24_s28   ;;  %s1483_s27 = sphi %s1543_s27, %s2508_s27   ;;  %s1479_s26 = sphi %s1541_s26, %s2507_s26   ;;  %s1475_s25 = sphi %s1539_s25, %s2506_s25   ;;  %s1471_s24 = sphi %s1537_s24, %s2517_s24   ;;  %s1467_s23 = sphi %s1535_s23, %s2504_s23   ;;  %s1463_s22 = sphi %s1533_s22, %s2516_s22   ;;  %s1459_s21 = sphi %s1531_s21, %s2515_s21   ;;  %s1455_s20 = sphi %s1529_s20, %s2514_s20   ;;  %s1451_s19 = sphi %s1527_s19, %s2513_s19   ;;  %s1447_s18 = sphi %s1525_s18, %s2512_s18   ;;  %s1443_s17 = sphi %s1523_s17, %s2511_s17   ;;  %s1439_s16 = sphi %s1521_s16, %s2510_s16   ;;  %s1435_s15 = sphi %s1519_s15, %s2509_s15  }
  0x13   : > { %2469 = sst [smem:[#allocation16_spill]] %s1467_s23  ;;  %s1074_s30 = sadd.s32 4294967294, %s1487_s28  }
  0x14   : > { %2470 = sst [smem:[#allocation17_spill]] %s1471_s24  ;;  %p1589_p0 = scmp.eq.s32.totalorder %s1073_s29, 0 }
  0x15   : > { %2471 = sst [smem:[#allocation18_spill]] %s1479_s26  ;;  %p93_p1 = scmp.ne.s32.totalorder %s1451_s19, %s1447_s18 }
  0x16   : > { %2472 = sst [smem:[#allocation19_spill]] %s1483_s27  ;;  %p165_p2 = scmp.ne.s32.totalorder %s1443_s17, %s1439_s16 }
  0x17   : > { %p166_p3 = scmp.eq.s32.totalorder %s1073_s29, 3  ;;  %p1598_p4 = por %p93_p1, %p1589_p0 }
  0x18   : > { %p171_p5 = scmp.ne.s32.totalorder %s1439_s16, %s1435_s15  ;;  %p172_p7 = scmp.eq.s32.totalorder %s1074_s30, 3 }
  0x19   : > { %p1604_p6 = por %p166_p3, %p165_p2  ;;  %p1075_p8 = scmp.ge.s32.totalorder %s1487_s28, 1 }
  0x1a   : > { %p179_p9 = scmp.lt.s32.totalorder %s1487_s28, 5  ;;  %p1610_p10 = por %p172_p7, %p171_p5 }
  0x1b   : > { %s2475_s7 = scalar_select %p1604_p6, 1, 0 }
  0x1c   : > { %s2477_s8 = scalar_select %p1610_p10, 1, 0 }
  0x1d   : > { %2476 = sst [smem:[#allocation20_spill]] %s2475_s7  ;;  %p1614_p11 = pnand %p1075_p8, %p179_p9 }
  0x1e   : > { %2478 = sst [smem:[#allocation21_spill]] %s2477_s8  ;;  %s1489_s13 = smov [#allocation9]  }
  0x1f   : > { %s2480_s2 = sld [smem:[#allocation28_spill]]  ;;  %p1121_p12 = pneg %p1614_p11 }
  0x20   : > { %s36_s14 = sadd.s32 1, %s1479_s26  ;;  %s39_s18 = sadd.s32 1, %s1483_s27 }
  0x21   : > { %p1122_p13 = pnand %p1121_p12, %p1589_p0  ;;  %p37_p1 = scmp.ge.s32.totalorder %s36_s14, 2 }
  0x22   : > { %s52_s29 = sadd.s32 1, %s1467_s23  ;;  %p59_p2 = scmp.ne.s32.totalorder %s1467_s23, %s1463_s22 }
  0x23   : > { %p60_p3 = scmp.eq.s32.totalorder %s1487_s28, 0  ;;  %s2519_s14 = smov (%p37_p1, %s36_s14), 0 }
  0x24   : > { %2481 = sst [smem:[#allocation22_spill]] %s2519_s14  ;;  %s2521_s18 = smov (!%p37_p1, %s39_s18), %s1483_s27 }
  0x25   : > { %s191_s12 = sshll.u32 %s2480_s2, 4  ;;  %s48_s30 = ssub.s32 %s1479_s26, %s2519_s14  ;;  %s192_s12 = int_to_ptr.hbm [resolvable:$true] %s191_s12 }
  0x26   : > { %1124 = dma.hbm_to_smem (!%p1122_p13), %s192_s12, 16, %s1489_s13, [#allocation6]  }
  0x27   : > { %p1638_p5 = por %p60_p3, %p59_p2  ;;  %p41_p7 = scmp.ge.s32.totalorder %s2521_s18, 2 }
  0x28   : > { %p50_p8 = scmp.eq.s32.totalorder %s48_s30, 0  ;;  %p65_p9 = scmp.ne.s32.totalorder %s1463_s22, %s1459_s21 }
  0x29   : > { %s80_s11 = sadd.s32 1, %s1455_s20  ;;  %s2523_s18 = smov (%p41_p7, %s2521_s18), 0 }
  0x2a   : > { %2483 = sst [smem:[#allocation23_spill]] %s2523_s18  ;;  %p1652_p12 = por %p1589_p0, %p65_p9 }
  0x2b   : > { %s1648_s12 = scalar_select %p50_p8, %s1467_s23, %s52_s29  }
  0x2c   : > { %s76_s2 = ssub.s32 %s1483_s27, %s2523_s18  ;;  %p87_p13 = scmp.ne.s32.totalorder %s1455_s20, %s1451_s19 }
  0x2d   : > { %2484 = sst [smem:[#allocation24_spill]] %s1648_s12  ;;  %s77_s14 = sor.u32 %s76_s2, %s48_s30 }
  0x2e   : > { %p78_p1 = scmp.eq.s32.totalorder %s77_s14, 0  ;;  %p153_p2 = scmp.eq.s32.totalorder %s76_s2, 0 }
  0x2f   : > { %p1662_p10 = por %p87_p13, %p60_p3  ;;  %s155_s29 = sadd.s32 1, %s1443_s17 }
  0x30   : > { %s1668_s12 = scalar_select %p78_p1, %s1455_s20, %s80_s11  }
  0x31   : > { %s1671_s8 = scalar_select %p153_p2, %s1443_s17, %s155_s29  }
  0x32   : > { %2487 = sst [smem:[#allocation25_spill]] %s1668_s12  ;;  %p1137_p7 = scmp.lt.s32.totalorder %s1487_s28, 4 }
  0x33   : > { %2488 = sst [smem:[#allocation26_spill]] %s1671_s8  ;;  %s202_s15 = sand.u32 1, %s1467_s23  }
  0x34   : > { %s1078_s18 = sshll.u32 %s202_s15, 3  ;;  %s1079_s30 = sshll.u32 %s1479_s26, 3 }
  0x35   : > { %s2489_s0 = sld [smem:[#allocation27_spill]]  ;;  %s206_s7 = scalar_lea.vmem [#allocation3], %s1078_s18 }
  0x36   : > { %s216_s24 = sshll.u32 %s206_s7, 4  ;;  %p1126_p3 = pnand %p1137_p7, %p1638_p5  ;;  %s217_s24 = int_to_ptr.vmem [resolvable:$true] %s216_s24 }
  0x37   : > { %s232_s11 = sadd.s32 %s1483_s27, %s1079_s30  ;;  %p1684_p8 = pnand %p1137_p7, %p1662_p10 }
  0x38   : > { %s1083_s23 = sshll.u32 %s232_s11, 3  ;;  %s203_s26 = scalar_lea.sflag [#allocation4], %s202_s15 }
  0x39   : > { %s234_s18 = scalar_lea.hbm %s2450_s1, %s1083_s23  ;;  %s223_s14 = sand.u32 1, %s1455_s20  }
  0x3a   : > { %s235_s7 = sshll.u32 %s234_s18, 4  ;;  %s224_s21 = scalar_lea.sflag [#allocation8], %s223_s14  ;;  %s236_s7 = int_to_ptr.hbm [resolvable:$true] %s235_s7 }
  0x3b   : > { %s212_s2 = scalar_lea.hbm %s2489_s0, %s1079_s30  ;;  %s1490_s30 = smov 256  }
  0x3c   : > { %s214_s3 = sshll.u32 %s212_s2, 4  ;;  %s1080_s2 = sshll.u32 %s223_s14, 5  ;;  %s215_s3 = int_to_ptr.hbm [resolvable:$true] %s214_s3 }
  0x3d   : > { %1128 = dma.hbm_to_vmem [thread:$0]  (!%p1126_p3), %s215_s3, 128, %s217_s24, %s203_s26  }
  0x3e   : > { %s227_s10 = scalar_lea.vmem [#allocation7], %s1080_s2  ;;  %s1491_s27 = smov 128  }
  0x3f   : > { %s237_s0 = sshll.u32 %s227_s10, 4  ;;  %s1492_s8 = smov 8   ;;  %s238_s0 = int_to_ptr.vmem [resolvable:$true] %s237_s0 }
  0x40   : > { %1131 = dma.hbm_to_vmem [thread:$0]  (!%p1684_p8), %s236_s7, 512, %s238_s0, %s224_s21, %s1490_s30, %s1491_s27, %s1492_s8  }
  0x41   : > { %255 = sbr.rel (%p1614_p11) target bundleno = 401 (0x191), region = 36  ;;  %s257_s3 = sand.u32 (!%p1614_p11), 1, %s1463_s22  }
  0x42   : > { %s1697_s15 = sshll.u32 (!%p1614_p11), %s257_s3, 3  ;;  %s258_s23 = scalar_lea.sflag (!%p1614_p11), [#allocation4], %s257_s3 }
  0x43   : > { %s261_s24 = scalar_lea.vmem (!%p1614_p11), [#allocation3], %s1697_s15 }
  0x46   : > { %1418 = dma.done.wait (%p1652_p12), %s258_s23, 128  }
  0x47   : > { %1420 = vsyncadd (%p1652_p12), %s258_s23, 4294967168  ;;  %s267_s26 = sand.u32 1, %s1451_s19  }
  0x48   : > { %s1086_s0 = sshll.u32 %s267_s26, 5  ;;  %s268_s27 = scalar_lea.sflag [#allocation8], %s267_s26 }
  0x49   : > { %s1705_s8 = scalar_lea.vmem [#allocation7], %s1086_s0 }
  0x4a   : > { %1422 = dma.done.wait (%p1598_p4), %s268_s27, 512  }
  0x4b   : > { %1424 = vsyncadd (%p1598_p4), %s268_s27, 4294966784 }
  0x4c   : > { %1426 = dma.done.wait (%p1589_p0), [#allocation6], 16  }
  0x4d   : > { %1428 = vsyncadd (%p1589_p0), [#allocation6], 4294967280 }
  0x4e   : > { %282 = sfence }
  0x4f   : > { %s308_s9 = sand.u32 1, %s1439_s16   ;;  %p312_p10 = scmp.lt.s32.totalorder %s1475_s25, 1 }
  0x50   : > { %s1719_s12 = sshll.u32 %s308_s9, 3  ;;  %s2491_s29 = sld [smem:[#allocation29_spill]] }
  0x51   : > { %s1722_s13 = scalar_select %p312_p10, %s1475_s25, 1 }
  0x52   : > { %s310_s5 = scalar_lea.vmem [#allocation10], %s1719_s12  ;;  %s2492_s18 = sld [smem:[#allocation17_spill]] }
  0x56   : > { %s314_s4 = scalar_lea.vmem %s2491_s29, %s1722_s13 }
  0x58   : > { %p1089_p0 = scmp.ne.s32.totalorder %s2492_s18, 0 }
  0x5a   : > { %318 = sbr.rel (%p1089_p0) target bundleno = 97 (0x61), region = 52 }
  0x5f   : > { %v1493_v0 = vmov 0.0  }
  0x60   : > { %319 = vst [vmem:[#allocation2] sm:$0xff] %v1493_v0 }
  0x61 PF: > { %v323_v1 = vld [vmem:[%s1705_s8 + $0x18] sm:$0xff]  ;;  %s356_s7 = sld [smem:[#allocation9]]  ;;  %v1732_v2 = vld [vmem:[%s1705_s8 + $0x10] sm:$0xff] }
  0x62   : > { %v1734_v3 = vunpack.c.2.s8 %v323_v1  ;;  %v1736_v4 = vunpack.c.3.s8 %v323_v1  ;;  %s1090_s14 = sld [smem:[#allocation9 + $0x1]]  ;;  %v1740_v5 = vunpack.c.0.s8 %v323_v1  ;;  %v1742_v6 = vunpack.c.1.s8 %v323_v1 }
  0x63   : > { %s1738_s2 = sld [smem:[#allocation9 + $0x2]]  ;;  %v1745_v7 = vunpack.c.2.s8 %v1732_v2  ;;  %v1748_v8 = vunpack.c.3.s8 %v1732_v2 }
  0x64   : > { %vm354_vm0 = vcmp.eq.s32.totalorder %v1734_v3, 0  ;;  %vm355_vm1 = vcmp.eq.s32.totalorder %v1736_v4, 0  ;;  %vm388_vm2 = vcmp.eq.s32.totalorder %v1734_v3, 1  ;;  %vm389_vm3 = vcmp.eq.s32.totalorder %v1736_v4, 1  ;;  %s1092_s10 = sld [smem:[#allocation9 + $0x3]] }
  0x65   : > { %vm422_vm4 = vcmp.eq.s32.totalorder %v1734_v3, 2  ;;  %vm423_vm5 = vcmp.eq.s32.totalorder %v1736_v4, 2  ;;  %vm456_vm6 = vcmp.eq.s32.totalorder %v1734_v3, 3  ;;  %vm457_vm7 = vcmp.eq.s32.totalorder %v1736_v4, 3  ;;  %s1093_s21 = sld [smem:[#allocation9 + $0x4]] }
  0x66   : > { %vm490_vm8 = vcmp.eq.s32.totalorder %v1734_v3, 4  ;;  %vm491_vm9 = vcmp.eq.s32.totalorder %v1736_v4, 4  ;;  %vm524_vm10 = vcmp.eq.s32.totalorder %v1734_v3, 5  ;;  %vm525_vm11 = vcmp.eq.s32.totalorder %v1736_v4, 5  ;;  %s1094_s30 = sld [smem:[#allocation9 + $0x5]] }
  0x67   : > { %v1762_v9 = vstv %s356_s7  ;;  %vm558_vm12 = vcmp.eq.s32.totalorder %v1734_v3, 6  ;;  %vm559_vm13 = vcmp.eq.s32.totalorder %v1736_v4, 6  ;;  %s1095_s3 = sld [smem:[#allocation9 + $0x6]]  ;;  %vm592_vm14 = vcmp.eq.s32.totalorder %v1734_v3, 7 }
  0x68   : > { %v372_v10 = vsel %vm354_vm0, %v1762_v9, 0.0  ;;  %v373_v11 = vsel %vm355_vm1, %v1762_v9, 0.0  ;;  %v1773_v12 = vstv %s1090_s14  ;;  %vm593_vm15 = vcmp.eq.s32.totalorder %v1736_v4, 7  ;;  %s1096_s23 = sld [smem:[#allocation9 + $0x7]] }
  0x69   : > { %v406_v13 = vsel %vm388_vm2, %v1773_v12, %v372_v10  ;;  %v407_v14 = vsel %vm389_vm3, %v1773_v12, %v373_v11  ;;  %v1783_v15 = vstv %s1738_s2  ;;  %vm626_vm0 = vcmp.eq.s32.totalorder %v1734_v3, 8  ;;  %s1097_s26 = sld [smem:[#allocation9 + $0x8]] }
  0x6a   : > { %v440_v16 = vsel %vm422_vm4, %v1783_v15, %v406_v13  ;;  %v441_v17 = vsel %vm423_vm5, %v1783_v15, %v407_v14  ;;  %v1792_v18 = vstv %s1092_s10  ;;  %vm627_vm1 = vcmp.eq.s32.totalorder %v1736_v4, 8  ;;  %s1098_s0 = sld [smem:[#allocation9 + $0x9]] }
  0x6b   : > { %v474_v19 = vsel %vm456_vm6, %v1792_v18, %v440_v16  ;;  %v475_v20 = vsel %vm457_vm7, %v1792_v18, %v441_v17  ;;  %v1801_v21 = vstv %s1093_s21  ;;  %vm660_vm2 = vcmp.eq.s32.totalorder %v1734_v3, 9  ;;  %s1099_s27 = sld [smem:[#allocation9 + $0xa]] }
  0x6c   : > { %v508_v22 = vsel %vm490_vm8, %v1801_v21, %v474_v19  ;;  %v509_v23 = vsel %vm491_vm9, %v1801_v21, %v475_v20  ;;  %v1810_v24 = vstv %s1094_s30  ;;  %vm661_vm3 = vcmp.eq.s32.totalorder %v1736_v4, 9  ;;  %s1100_s6 = sld [smem:[#allocation9 + $0xb]] }
  0x6d   : > { %v542_v25 = vsel %vm524_vm10, %v1810_v24, %v508_v22  ;;  %v543_v26 = vsel %vm525_vm11, %v1810_v24, %v509_v23  ;;  %v1819_v27 = vstv %s1095_s3  ;;  %vm694_vm4 = vcmp.eq.s32.totalorder %v1734_v3, 10  ;;  %s1101_s11 = sld [smem:[#allocation9 + $0xc]] }
  0x6e   : > { %v576_v28 = vsel %vm558_vm12, %v1819_v27, %v542_v25  ;;  %v577_v29 = vsel %vm559_vm13, %v1819_v27, %v543_v26  ;;  %v1828_v30 = vstv %s1096_s23  ;;  %vm695_vm5 = vcmp.eq.s32.totalorder %v1736_v4, 10  ;;  %s1102_s29 = sld [smem:[#allocation9 + $0xd]] }
  0x6f   : > { %v610_v31 = vsel %vm592_vm14, %v1828_v30, %v576_v28  ;;  %v611_v32 = vsel %vm593_vm15, %v1828_v30, %v577_v29  ;;  %v1837_v33 = vstv %s1097_s26  ;;  %vm728_vm6 = vcmp.eq.s32.totalorder %v1734_v3, 11  ;;  %s1103_s18 = sld [smem:[#allocation9 + $0xe]] }
  0x70   : > { %v644_v34 = vsel %vm626_vm0, %v1837_v33, %v610_v31  ;;  %v645_v35 = vsel %vm627_vm1, %v1837_v33, %v611_v32  ;;  %v1846_v36 = vstv %s1098_s0  ;;  %vm729_vm7 = vcmp.eq.s32.totalorder %v1736_v4, 11  ;;  %s1104_s7 = sld [smem:[#allocation9 + $0xf]] }
  0x71   : > { %v678_v37 = vsel %vm660_vm2, %v1846_v36, %v644_v34  ;;  %v679_v38 = vsel %vm661_vm3, %v1846_v36, %v645_v35  ;;  %v1855_v39 = vstv %s1099_s27  ;;  %vm762_vm8 = vcmp.eq.s32.totalorder %v1734_v3, 12 }
  0x72   : > { %v712_v40 = vsel %vm694_vm4, %v1855_v39, %v678_v37  ;;  %v713_v41 = vsel %vm695_vm5, %v1855_v39, %v679_v38  ;;  %v1864_v42 = vstv %s1100_s6  ;;  %vm763_vm9 = vcmp.eq.s32.totalorder %v1736_v4, 12 }
  0x73   : > { %v746_v43 = vsel %vm728_vm6, %v1864_v42, %v712_v40  ;;  %v747_v44 = vsel %vm729_vm7, %v1864_v42, %v713_v41  ;;  %v1869_v45 = vstv %s1101_s11  ;;  %vm796_vm10 = vcmp.eq.s32.totalorder %v1734_v3, 13 }
  0x74   : > { %v780_v46 = vsel %vm762_vm8, %v1869_v45, %v746_v43  ;;  %v781_v47 = vsel %vm763_vm9, %v1869_v45, %v747_v44  ;;  %vm797_vm11 = vcmp.eq.s32.totalorder %v1736_v4, 13  ;;  %v1875_v48 = vstv %s1102_s29 }
  0x75   : > { %v814_v49 = vsel %vm796_vm10, %v1875_v48, %v780_v46  ;;  %v815_v50 = vsel %vm797_vm11, %v1875_v48, %v781_v47  ;;  %vm830_vm12 = vcmp.eq.s32.totalorder %v1734_v3, 14  ;;  %vm831_vm13 = vcmp.eq.s32.totalorder %v1736_v4, 14 }
  0x76   : > { %v1881_v51 = vstv %s1103_s18  ;;  %vm864_vm14 = vcmp.eq.s32.totalorder %v1734_v3, 15  ;;  %vm865_vm15 = vcmp.eq.s32.totalorder %v1736_v4, 15  ;;  %v1885_v52 = vstv %s1104_s7 }
  0x77   : > { %v848_v53 = vsel %vm830_vm12, %v1881_v51, %v814_v49  ;;  %v849_v54 = vsel %vm831_vm13, %v1881_v51, %v815_v50  ;;  %vm352_vm0 = vcmp.eq.s32.totalorder %v1740_v5, 0  ;;  %vm353_vm1 = vcmp.eq.s32.totalorder %v1742_v6, 0 }
  0x78   : > { %v882_v55 = vsel %vm864_vm14, %v1885_v52, %v848_v53  ;;  %v883_v56 = vsel %vm865_vm15, %v1885_v52, %v849_v54  ;;  %v370_v57 = vsel %vm352_vm0, %v1762_v9, 0.0  ;;  %v371_v58 = vsel %vm353_vm1, %v1762_v9, 0.0 }
  0x79   : > { %v894_v59 = vpack.c.bf16 %v883_v56, %v882_v55  ;;  %vm386_vm2 = vcmp.eq.s32.totalorder %v1740_v5, 1  ;;  %vm387_vm3 = vcmp.eq.s32.totalorder %v1742_v6, 1  ;;  %vm420_vm4 = vcmp.eq.s32.totalorder %v1740_v5, 2 }
  0x7a   : > { %v404_v60 = vsel %vm386_vm2, %v1773_v12, %v370_v57  ;;  %v405_v61 = vsel %vm387_vm3, %v1773_v12, %v371_v58  ;;  %vm421_vm5 = vcmp.eq.s32.totalorder %v1742_v6, 2  ;;  %vm454_vm6 = vcmp.eq.s32.totalorder %v1740_v5, 3 }
  0x7b   : > { %895 = vmatpush.bf16.msra.mxu0 %v894_v59  ;;  %v438_v62 = vsel %vm420_vm4, %v1783_v15, %v404_v60  ;;  %v439_v63 = vsel %vm421_vm5, %v1783_v15, %v405_v61  ;;  %vm455_vm7 = vcmp.eq.s32.totalorder %v1742_v6, 3  ;;  %vm488_vm8 = vcmp.eq.s32.totalorder %v1740_v5, 4 }
  0x7c   : > { %v472_v0 = vsel %vm454_vm6, %v1792_v18, %v438_v62  ;;  %v473_v1 = vsel %vm455_vm7, %v1792_v18, %v439_v63  ;;  %vm489_vm9 = vcmp.eq.s32.totalorder %v1742_v6, 4  ;;  %vm522_vm10 = vcmp.eq.s32.totalorder %v1740_v5, 5 }
  0x7d   : > { %v506_v3 = vsel %vm488_vm8, %v1801_v21, %v472_v0  ;;  %v507_v4 = vsel %vm489_vm9, %v1801_v21, %v473_v1  ;;  %vm523_vm11 = vcmp.eq.s32.totalorder %v1742_v6, 5  ;;  %vm556_vm12 = vcmp.eq.s32.totalorder %v1740_v5, 6 }
  0x7e   : > { %v540_v10 = vsel %vm522_vm10, %v1810_v24, %v506_v3  ;;  %v541_v11 = vsel %vm523_vm11, %v1810_v24, %v507_v4  ;;  %vm557_vm13 = vcmp.eq.s32.totalorder %v1742_v6, 6  ;;  %vm590_vm14 = vcmp.eq.s32.totalorder %v1740_v5, 7 }
  0x7f   : > { %v574_v13 = vsel %vm556_vm12, %v1819_v27, %v540_v10  ;;  %v575_v14 = vsel %vm557_vm13, %v1819_v27, %v541_v11  ;;  %vm591_vm15 = vcmp.eq.s32.totalorder %v1742_v6, 7  ;;  %vm624_vm0 = vcmp.eq.s32.totalorder %v1740_v5, 8 }
  0x80   : > { %v608_v16 = vsel %vm590_vm14, %v1828_v30, %v574_v13  ;;  %v609_v17 = vsel %vm591_vm15, %v1828_v30, %v575_v14  ;;  %vm625_vm1 = vcmp.eq.s32.totalorder %v1742_v6, 8  ;;  %vm658_vm2 = vcmp.eq.s32.totalorder %v1740_v5, 9 }
  0x81   : > { %v642_v19 = vsel %vm624_vm0, %v1837_v33, %v608_v16  ;;  %v643_v20 = vsel %vm625_vm1, %v1837_v33, %v609_v17  ;;  %vm659_vm3 = vcmp.eq.s32.totalorder %v1742_v6, 9  ;;  %vm692_vm4 = vcmp.eq.s32.totalorder %v1740_v5, 10 }
  0x82   : > { %v676_v22 = vsel %vm658_vm2, %v1846_v36, %v642_v19  ;;  %v677_v23 = vsel %vm659_vm3, %v1846_v36, %v643_v20  ;;  %vm693_vm5 = vcmp.eq.s32.totalorder %v1742_v6, 10  ;;  %vm726_vm6 = vcmp.eq.s32.totalorder %v1740_v5, 11  ;;  %v2014_v19 = vld [vmem:[%s1705_s8 + $0x8] sm:$0xff] }
  0x83   : > { %v710_v25 = vsel %vm692_vm4, %v1855_v39, %v676_v22  ;;  %v711_v26 = vsel %vm693_vm5, %v1855_v39, %v677_v23  ;;  %vm727_vm7 = vcmp.eq.s32.totalorder %v1742_v6, 11  ;;  %vm760_vm8 = vcmp.eq.s32.totalorder %v1740_v5, 12 }
  0x84   : > { %v744_v28 = vsel %vm726_vm6, %v1864_v42, %v710_v25  ;;  %v745_v29 = vsel %vm727_vm7, %v1864_v42, %v711_v26  ;;  %vm761_vm9 = vcmp.eq.s32.totalorder %v1742_v6, 12  ;;  %vm794_vm10 = vcmp.eq.s32.totalorder %v1740_v5, 13 }
  0x85   : > { %v778_v31 = vsel %vm760_vm8, %v1869_v45, %v744_v28  ;;  %v779_v32 = vsel %vm761_vm9, %v1869_v45, %v745_v29  ;;  %vm795_vm11 = vcmp.eq.s32.totalorder %v1742_v6, 13  ;;  %vm828_vm12 = vcmp.eq.s32.totalorder %v1740_v5, 14 }
  0x86   : > { %v812_v34 = vsel %vm794_vm10, %v1875_v48, %v778_v31  ;;  %v813_v35 = vsel %vm795_vm11, %v1875_v48, %v779_v32  ;;  %vm829_vm13 = vcmp.eq.s32.totalorder %v1742_v6, 14  ;;  %vm862_vm14 = vcmp.eq.s32.totalorder %v1740_v5, 15 }
  0x87   : > { %v846_v37 = vsel %vm828_vm12, %v1881_v51, %v812_v34  ;;  %v847_v38 = vsel %vm829_vm13, %v1881_v51, %v813_v35  ;;  %vm863_vm15 = vcmp.eq.s32.totalorder %v1742_v6, 15  ;;  %vm350_vm0 = vcmp.eq.s32.totalorder %v1745_v7, 0 }
  0x88   : > { %v880_v40 = vsel %vm862_vm14, %v1885_v52, %v846_v37  ;;  %v881_v41 = vsel %vm863_vm15, %v1885_v52, %v847_v38  ;;  %vm351_vm1 = vcmp.eq.s32.totalorder %v1748_v8, 0  ;;  %v368_v43 = vsel %vm350_vm0, %v1762_v9, 0.0 }
  0x89   : > { %v893_v44 = vpack.c.bf16 %v881_v41, %v880_v40  ;;  %v369_v46 = vsel %vm351_vm1, %v1762_v9, 0.0  ;;  %vm384_vm2 = vcmp.eq.s32.totalorder %v1745_v7, 1  ;;  %vm385_vm3 = vcmp.eq.s32.totalorder %v1748_v8, 1 }
  0x8a   : > { %v402_v5 = vsel %vm384_vm2, %v1773_v12, %v368_v43  ;;  %v403_v6 = vsel %vm385_vm3, %v1773_v12, %v369_v46  ;;  %vm418_vm4 = vcmp.eq.s32.totalorder %v1745_v7, 2  ;;  %vm419_vm5 = vcmp.eq.s32.totalorder %v1748_v8, 2 }
  0x8b   : > { %896 = vmatpush.bf16.msra.mxu0 %v893_v44  ;;  %v436_v47 = vsel %vm418_vm4, %v1783_v15, %v402_v5  ;;  %v437_v49 = vsel %vm419_vm5, %v1783_v15, %v403_v6  ;;  %vm452_vm6 = vcmp.eq.s32.totalorder %v1745_v7, 3  ;;  %vm453_vm7 = vcmp.eq.s32.totalorder %v1748_v8, 3 }
  0x8c   : > { %v470_v50 = vsel %vm452_vm6, %v1792_v18, %v436_v47  ;;  %v471_v53 = vsel %vm453_vm7, %v1792_v18, %v437_v49  ;;  %vm486_vm8 = vcmp.eq.s32.totalorder %v1745_v7, 4  ;;  %vm487_vm9 = vcmp.eq.s32.totalorder %v1748_v8, 4 }
  0x8d   : > { %v504_v54 = vsel %vm486_vm8, %v1801_v21, %v470_v50  ;;  %v505_v55 = vsel %vm487_vm9, %v1801_v21, %v471_v53  ;;  %vm520_vm10 = vcmp.eq.s32.totalorder %v1745_v7, 5  ;;  %vm521_vm11 = vcmp.eq.s32.totalorder %v1748_v8, 5 }
  0x8e   : > { %v538_v56 = vsel %vm520_vm10, %v1810_v24, %v504_v54  ;;  %v539_v57 = vsel %vm521_vm11, %v1810_v24, %v505_v55  ;;  %vm554_vm12 = vcmp.eq.s32.totalorder %v1745_v7, 6  ;;  %vm555_vm13 = vcmp.eq.s32.totalorder %v1748_v8, 6 }
  0x8f   : > { %v572_v58 = vsel %vm554_vm12, %v1819_v27, %v538_v56  ;;  %v573_v59 = vsel %vm555_vm13, %v1819_v27, %v539_v57  ;;  %vm588_vm14 = vcmp.eq.s32.totalorder %v1745_v7, 7  ;;  %vm589_vm15 = vcmp.eq.s32.totalorder %v1748_v8, 7 }
  0x90   : > { %v606_v60 = vsel %vm588_vm14, %v1828_v30, %v572_v58  ;;  %v607_v61 = vsel %vm589_vm15, %v1828_v30, %v573_v59  ;;  %vm622_vm0 = vcmp.eq.s32.totalorder %v1745_v7, 8  ;;  %vm623_vm1 = vcmp.eq.s32.totalorder %v1748_v8, 8 }
  0x91   : > { %v640_v62 = vsel %vm622_vm0, %v1837_v33, %v606_v60  ;;  %v641_v63 = vsel %vm623_vm1, %v1837_v33, %v607_v61  ;;  %vm656_vm2 = vcmp.eq.s32.totalorder %v1745_v7, 9  ;;  %vm657_vm3 = vcmp.eq.s32.totalorder %v1748_v8, 9 }
  0x92   : > { %v674_v0 = vsel %vm656_vm2, %v1846_v36, %v640_v62  ;;  %v675_v1 = vsel %vm657_vm3, %v1846_v36, %v641_v63  ;;  %vm690_vm4 = vcmp.eq.s32.totalorder %v1745_v7, 10  ;;  %vm691_vm5 = vcmp.eq.s32.totalorder %v1748_v8, 10 }
  0x93   : > { %v708_v3 = vsel %vm690_vm4, %v1855_v39, %v674_v0  ;;  %v709_v4 = vsel %vm691_vm5, %v1855_v39, %v675_v1  ;;  %vm724_vm6 = vcmp.eq.s32.totalorder %v1745_v7, 11  ;;  %vm725_vm7 = vcmp.eq.s32.totalorder %v1748_v8, 11 }
  0x94   : > { %v742_v10 = vsel %vm724_vm6, %v1864_v42, %v708_v3  ;;  %v743_v11 = vsel %vm725_vm7, %v1864_v42, %v709_v4  ;;  %vm758_vm8 = vcmp.eq.s32.totalorder %v1745_v7, 12  ;;  %vm759_vm9 = vcmp.eq.s32.totalorder %v1748_v8, 12 }
  0x95   : > { %v776_v13 = vsel %vm758_vm8, %v1869_v45, %v742_v10  ;;  %v777_v14 = vsel %vm759_vm9, %v1869_v45, %v743_v11  ;;  %vm792_vm10 = vcmp.eq.s32.totalorder %v1745_v7, 13  ;;  %vm793_vm11 = vcmp.eq.s32.totalorder %v1748_v8, 13 }
  0x96   : > { %v810_v16 = vsel %vm792_vm10, %v1875_v48, %v776_v13  ;;  %v811_v17 = vsel %vm793_vm11, %v1875_v48, %v777_v14  ;;  %vm826_vm12 = vcmp.eq.s32.totalorder %v1745_v7, 14  ;;  %vm827_vm13 = vcmp.eq.s32.totalorder %v1748_v8, 14 }
  0x97   : > { %v844_v20 = vsel %vm826_vm12, %v1881_v51, %v810_v16  ;;  %v845_v22 = vsel %vm827_vm13, %v1881_v51, %v811_v17  ;;  %vm860_vm14 = vcmp.eq.s32.totalorder %v1745_v7, 15  ;;  %vm861_vm15 = vcmp.eq.s32.totalorder %v1748_v8, 15 }
  0x98   : > { %v878_v23 = vsel %vm860_vm14, %v1885_v52, %v844_v20  ;;  %v879_v25 = vsel %vm861_vm15, %v1885_v52, %v845_v22  ;;  %v2023_v26 = vunpack.c.0.s8 %v1732_v2  ;;  %v2026_v28 = vunpack.c.1.s8 %v1732_v2 }
  0x99   : > { %v892_v29 = vpack.c.bf16 %v879_v25, %v878_v23  ;;  %v2029_v31 = vunpack.c.2.s8 %v2014_v19  ;;  %v2032_v32 = vunpack.c.3.s8 %v2014_v19  ;;  %v2035_v7 = vunpack.c.0.s8 %v2014_v19 }
  0x9a   : > { %vm348_vm0 = vcmp.eq.s32.totalorder %v2023_v26, 0  ;;  %vm349_vm1 = vcmp.eq.s32.totalorder %v2026_v28, 0  ;;  %vm382_vm2 = vcmp.eq.s32.totalorder %v2023_v26, 1  ;;  %vm383_vm3 = vcmp.eq.s32.totalorder %v2026_v28, 1 }
  0x9b   : > { %897 = vmatpush.bf16.msra.mxu0 %v892_v29  ;;  %v366_v2 = vsel %vm348_vm0, %v1762_v9, 0.0  ;;  %v367_v8 = vsel %vm349_vm1, %v1762_v9, 0.0  ;;  %vm416_vm4 = vcmp.eq.s32.totalorder %v2023_v26, 2  ;;  %vm417_vm5 = vcmp.eq.s32.totalorder %v2026_v28, 2 }
  0x9c   : > { %v400_v34 = vsel %vm382_vm2, %v1773_v12, %v366_v2  ;;  %v401_v35 = vsel %vm383_vm3, %v1773_v12, %v367_v8  ;;  %vm450_vm6 = vcmp.eq.s32.totalorder %v2023_v26, 3  ;;  %vm451_vm7 = vcmp.eq.s32.totalorder %v2026_v28, 3 }
  0x9d   : > { %v434_v37 = vsel %vm416_vm4, %v1783_v15, %v400_v34  ;;  %v435_v38 = vsel %vm417_vm5, %v1783_v15, %v401_v35  ;;  %vm484_vm8 = vcmp.eq.s32.totalorder %v2023_v26, 4  ;;  %vm485_vm9 = vcmp.eq.s32.totalorder %v2026_v28, 4 }
  0x9e   : > { %v468_v40 = vsel %vm450_vm6, %v1792_v18, %v434_v37  ;;  %v469_v41 = vsel %vm451_vm7, %v1792_v18, %v435_v38  ;;  %vm518_vm10 = vcmp.eq.s32.totalorder %v2023_v26, 5  ;;  %vm519_vm11 = vcmp.eq.s32.totalorder %v2026_v28, 5 }
  0x9f   : > { %v502_v43 = vsel %vm484_vm8, %v1801_v21, %v468_v40  ;;  %v503_v44 = vsel %vm485_vm9, %v1801_v21, %v469_v41  ;;  %vm552_vm12 = vcmp.eq.s32.totalorder %v2023_v26, 6  ;;  %vm553_vm13 = vcmp.eq.s32.totalorder %v2026_v28, 6 }
  0xa0   : > { %v536_v46 = vsel %vm518_vm10, %v1810_v24, %v502_v43  ;;  %v537_v5 = vsel %vm519_vm11, %v1810_v24, %v503_v44  ;;  %vm586_vm14 = vcmp.eq.s32.totalorder %v2023_v26, 7  ;;  %vm587_vm15 = vcmp.eq.s32.totalorder %v2026_v28, 7 }
  0xa1   : > { %v570_v6 = vsel %vm552_vm12, %v1819_v27, %v536_v46  ;;  %v571_v47 = vsel %vm553_vm13, %v1819_v27, %v537_v5  ;;  %vm620_vm0 = vcmp.eq.s32.totalorder %v2023_v26, 8  ;;  %vm621_vm1 = vcmp.eq.s32.totalorder %v2026_v28, 8 }
  0xa2   : > { %v604_v49 = vsel %vm586_vm14, %v1828_v30, %v570_v6  ;;  %v605_v50 = vsel %vm587_vm15, %v1828_v30, %v571_v47  ;;  %vm654_vm2 = vcmp.eq.s32.totalorder %v2023_v26, 9  ;;  %vm655_vm3 = vcmp.eq.s32.totalorder %v2026_v28, 9 }
  0xa3   : > { %v638_v53 = vsel %vm620_vm0, %v1837_v33, %v604_v49  ;;  %v639_v54 = vsel %vm621_vm1, %v1837_v33, %v605_v50  ;;  %vm688_vm4 = vcmp.eq.s32.totalorder %v2023_v26, 10  ;;  %vm689_vm5 = vcmp.eq.s32.totalorder %v2026_v28, 10 }
  0xa4   : > { %v672_v55 = vsel %vm654_vm2, %v1846_v36, %v638_v53  ;;  %v673_v56 = vsel %vm655_vm3, %v1846_v36, %v639_v54  ;;  %vm722_vm6 = vcmp.eq.s32.totalorder %v2023_v26, 11  ;;  %vm723_vm7 = vcmp.eq.s32.totalorder %v2026_v28, 11 }
  0xa5   : > { %v706_v57 = vsel %vm688_vm4, %v1855_v39, %v672_v55  ;;  %v707_v58 = vsel %vm689_vm5, %v1855_v39, %v673_v56  ;;  %vm756_vm8 = vcmp.eq.s32.totalorder %v2023_v26, 12  ;;  %vm757_vm9 = vcmp.eq.s32.totalorder %v2026_v28, 12 }
  0xa6   : > { %v740_v59 = vsel %vm722_vm6, %v1864_v42, %v706_v57  ;;  %v741_v60 = vsel %vm723_vm7, %v1864_v42, %v707_v58  ;;  %vm790_vm10 = vcmp.eq.s32.totalorder %v2023_v26, 13  ;;  %vm791_vm11 = vcmp.eq.s32.totalorder %v2026_v28, 13 }
  0xa7   : > { %v774_v61 = vsel %vm756_vm8, %v1869_v45, %v740_v59  ;;  %v775_v62 = vsel %vm757_vm9, %v1869_v45, %v741_v60  ;;  %vm824_vm12 = vcmp.eq.s32.totalorder %v2023_v26, 14  ;;  %vm825_vm13 = vcmp.eq.s32.totalorder %v2026_v28, 14 }
  0xa8   : > { %v808_v63 = vsel %vm790_vm10, %v1875_v48, %v774_v61  ;;  %v809_v0 = vsel %vm791_vm11, %v1875_v48, %v775_v62  ;;  %vm858_vm14 = vcmp.eq.s32.totalorder %v2023_v26, 15  ;;  %vm859_vm15 = vcmp.eq.s32.totalorder %v2026_v28, 15 }
  0xa9   : > { %v842_v1 = vsel %vm824_vm12, %v1881_v51, %v808_v63  ;;  %v843_v3 = vsel %vm825_vm13, %v1881_v51, %v809_v0  ;;  %vm346_vm0 = vcmp.eq.s32.totalorder %v2029_v31, 0  ;;  %vm347_vm1 = vcmp.eq.s32.totalorder %v2032_v32, 0 }
  0xaa   : > { %v876_v4 = vsel %vm858_vm14, %v1885_v52, %v842_v1  ;;  %v877_v10 = vsel %vm859_vm15, %v1885_v52, %v843_v3  ;;  %v364_v11 = vsel %vm346_vm0, %v1762_v9, 0.0  ;;  %v365_v13 = vsel %vm347_vm1, %v1762_v9, 0.0 }
  0xab   : > { %v891_v14 = vpack.c.bf16 %v877_v10, %v876_v4  ;;  %vm380_vm2 = vcmp.eq.s32.totalorder %v2029_v31, 1  ;;  %vm381_vm3 = vcmp.eq.s32.totalorder %v2032_v32, 1  ;;  %vm414_vm4 = vcmp.eq.s32.totalorder %v2029_v31, 2 }
  0xac   : > { %v398_v16 = vsel %vm380_vm2, %v1773_v12, %v364_v11  ;;  %v399_v17 = vsel %vm381_vm3, %v1773_v12, %v365_v13  ;;  %vm415_vm5 = vcmp.eq.s32.totalorder %v2032_v32, 2  ;;  %vm448_vm6 = vcmp.eq.s32.totalorder %v2029_v31, 3 }
  0xad   : > { %898 = vmatpush.bf16.msra.mxu0 %v891_v14  ;;  %v432_v20 = vsel %vm414_vm4, %v1783_v15, %v398_v16  ;;  %v433_v22 = vsel %vm415_vm5, %v1783_v15, %v399_v17  ;;  %vm449_vm7 = vcmp.eq.s32.totalorder %v2032_v32, 3  ;;  %vm482_vm8 = vcmp.eq.s32.totalorder %v2029_v31, 4 }
  0xae   : > { %v466_v23 = vsel %vm448_vm6, %v1792_v18, %v432_v20  ;;  %v467_v25 = vsel %vm449_vm7, %v1792_v18, %v433_v22  ;;  %vm483_vm9 = vcmp.eq.s32.totalorder %v2032_v32, 4  ;;  %vm516_vm10 = vcmp.eq.s32.totalorder %v2029_v31, 5 }
  0xaf   : > { %v500_v26 = vsel %vm482_vm8, %v1801_v21, %v466_v23  ;;  %v501_v28 = vsel %vm483_vm9, %v1801_v21, %v467_v25  ;;  %vm517_vm11 = vcmp.eq.s32.totalorder %v2032_v32, 5  ;;  %vm550_vm12 = vcmp.eq.s32.totalorder %v2029_v31, 6 }
  0xb0   : > { %v534_v29 = vsel %vm516_vm10, %v1810_v24, %v500_v26  ;;  %v535_v2 = vsel %vm517_vm11, %v1810_v24, %v501_v28  ;;  %vm551_vm13 = vcmp.eq.s32.totalorder %v2032_v32, 6  ;;  %vm584_vm14 = vcmp.eq.s32.totalorder %v2029_v31, 7 }
  0xb1   : > { %v568_v8 = vsel %vm550_vm12, %v1819_v27, %v534_v29  ;;  %v569_v34 = vsel %vm551_vm13, %v1819_v27, %v535_v2  ;;  %vm585_vm15 = vcmp.eq.s32.totalorder %v2032_v32, 7  ;;  %vm618_vm0 = vcmp.eq.s32.totalorder %v2029_v31, 8 }
  0xb2   : > { %v602_v35 = vsel %vm584_vm14, %v1828_v30, %v568_v8  ;;  %v603_v37 = vsel %vm585_vm15, %v1828_v30, %v569_v34  ;;  %vm619_vm1 = vcmp.eq.s32.totalorder %v2032_v32, 8  ;;  %vm652_vm2 = vcmp.eq.s32.totalorder %v2029_v31, 9  ;;  %v320_v8 = vld [vmem:[%s1705_s8] sm:$0xff]  ;;  %s2493_s8 = sld [smem:[#allocation17_spill]] }
  0xb3   : > { %v636_v38 = vsel %vm618_vm0, %v1837_v33, %v602_v35  ;;  %v637_v40 = vsel %vm619_vm1, %v1837_v33, %v603_v37  ;;  %vm653_vm3 = vcmp.eq.s32.totalorder %v2032_v32, 9  ;;  %vm686_vm4 = vcmp.eq.s32.totalorder %v2029_v31, 10 }
  0xb4   : > { %v670_v41 = vsel %vm652_vm2, %v1846_v36, %v636_v38  ;;  %v671_v43 = vsel %vm653_vm3, %v1846_v36, %v637_v40  ;;  %vm687_vm5 = vcmp.eq.s32.totalorder %v2032_v32, 10  ;;  %vm720_vm6 = vcmp.eq.s32.totalorder %v2029_v31, 11 }
  0xb5   : > { %v704_v44 = vsel %vm686_vm4, %v1855_v39, %v670_v41  ;;  %v705_v46 = vsel %vm687_vm5, %v1855_v39, %v671_v43  ;;  %vm721_vm7 = vcmp.eq.s32.totalorder %v2032_v32, 11  ;;  %vm754_vm8 = vcmp.eq.s32.totalorder %v2029_v31, 12 }
  0xb6   : > { %v738_v5 = vsel %vm720_vm6, %v1864_v42, %v704_v44  ;;  %v739_v6 = vsel %vm721_vm7, %v1864_v42, %v705_v46  ;;  %vm755_vm9 = vcmp.eq.s32.totalorder %v2032_v32, 12  ;;  %vm788_vm10 = vcmp.eq.s32.totalorder %v2029_v31, 13 }
  0xb7   : > { %v772_v47 = vsel %vm754_vm8, %v1869_v45, %v738_v5  ;;  %v773_v49 = vsel %vm755_vm9, %v1869_v45, %v739_v6  ;;  %vm789_vm11 = vcmp.eq.s32.totalorder %v2032_v32, 13  ;;  %vm822_vm12 = vcmp.eq.s32.totalorder %v2029_v31, 14 }
  0xb8   : > { %v806_v50 = vsel %vm788_vm10, %v1875_v48, %v772_v47  ;;  %v807_v53 = vsel %vm789_vm11, %v1875_v48, %v773_v49  ;;  %vm823_vm13 = vcmp.eq.s32.totalorder %v2032_v32, 14  ;;  %vm856_vm14 = vcmp.eq.s32.totalorder %v2029_v31, 15  ;;  %p1105_p4 = scmp.ne.s32.totalorder %s2493_s8, 1 }
  0xb9   : > { %v840_v54 = vsel %vm822_vm12, %v1881_v51, %v806_v50  ;;  %v841_v55 = vsel %vm823_vm13, %v1881_v51, %v807_v53  ;;  %vm857_vm15 = vcmp.eq.s32.totalorder %v2032_v32, 15  ;;  %v2164_v56 = vunpack.c.1.s8 %v2014_v19 }
  0xba   : > { %v874_v57 = vsel %vm856_vm14, %v1885_v52, %v840_v54  ;;  %v875_v58 = vsel %vm857_vm15, %v1885_v52, %v841_v55  ;;  %vm344_vm0 = vcmp.eq.s32.totalorder %v2035_v7, 0  ;;  %vm378_vm1 = vcmp.eq.s32.totalorder %v2035_v7, 1 }
  0xbb   : > { %v890_v59 = vpack.c.bf16 %v875_v58, %v874_v57  ;;  %vm345_vm2 = vcmp.eq.s32.totalorder %v2164_v56, 0  ;;  %v362_v31 = vsel %vm344_vm0, %v1762_v9, 0.0  ;;  %vm379_vm3 = vcmp.eq.s32.totalorder %v2164_v56, 1 }
  0xbc   : > { %v363_v32 = vsel %vm345_vm2, %v1762_v9, 0.0  ;;  %v396_v19 = vsel %vm378_vm1, %v1773_v12, %v362_v31  ;;  %vm412_vm4 = vcmp.eq.s32.totalorder %v2035_v7, 2  ;;  %vm413_vm5 = vcmp.eq.s32.totalorder %v2164_v56, 2 }
  0xbd   : > { %899 = vmatpush.bf16.msra.mxu0 %v890_v59  ;;  %v397_v60 = vsel %vm379_vm3, %v1773_v12, %v363_v32  ;;  %v430_v61 = vsel %vm412_vm4, %v1783_v15, %v396_v19  ;;  %vm446_vm6 = vcmp.eq.s32.totalorder %v2035_v7, 3  ;;  %vm447_vm7 = vcmp.eq.s32.totalorder %v2164_v56, 3 }
  0xbe   : > { %v431_v62 = vsel %vm413_vm5, %v1783_v15, %v397_v60  ;;  %v464_v63 = vsel %vm446_vm6, %v1792_v18, %v430_v61  ;;  %vm480_vm8 = vcmp.eq.s32.totalorder %v2035_v7, 4  ;;  %vm481_vm9 = vcmp.eq.s32.totalorder %v2164_v56, 4 }
  0xbf   : > { %v465_v0 = vsel %vm447_vm7, %v1792_v18, %v431_v62  ;;  %v498_v1 = vsel %vm480_vm8, %v1801_v21, %v464_v63  ;;  %vm514_vm10 = vcmp.eq.s32.totalorder %v2035_v7, 5  ;;  %vm515_vm11 = vcmp.eq.s32.totalorder %v2164_v56, 5 }
  0xc0   : > { %v499_v3 = vsel %vm481_vm9, %v1801_v21, %v465_v0  ;;  %v532_v4 = vsel %vm514_vm10, %v1810_v24, %v498_v1  ;;  %vm548_vm12 = vcmp.eq.s32.totalorder %v2035_v7, 6  ;;  %vm549_vm13 = vcmp.eq.s32.totalorder %v2164_v56, 6 }
  0xc1   : > { %v533_v10 = vsel %vm515_vm11, %v1810_v24, %v499_v3  ;;  %v566_v11 = vsel %vm548_vm12, %v1819_v27, %v532_v4  ;;  %vm582_vm14 = vcmp.eq.s32.totalorder %v2035_v7, 7  ;;  %vm583_vm15 = vcmp.eq.s32.totalorder %v2164_v56, 7 }
  0xc2   : > { %v567_v13 = vsel %vm549_vm13, %v1819_v27, %v533_v10  ;;  %v600_v14 = vsel %vm582_vm14, %v1828_v30, %v566_v11  ;;  %vm616_vm0 = vcmp.eq.s32.totalorder %v2035_v7, 8  ;;  %vm617_vm1 = vcmp.eq.s32.totalorder %v2164_v56, 8 }
  0xc3   : > { %v601_v16 = vsel %vm583_vm15, %v1828_v30, %v567_v13  ;;  %v634_v17 = vsel %vm616_vm0, %v1837_v33, %v600_v14  ;;  %vm650_vm2 = vcmp.eq.s32.totalorder %v2035_v7, 9  ;;  %vm651_vm3 = vcmp.eq.s32.totalorder %v2164_v56, 9 }
  0xc4   : > { %v635_v20 = vsel %vm617_vm1, %v1837_v33, %v601_v16  ;;  %v668_v22 = vsel %vm650_vm2, %v1846_v36, %v634_v17  ;;  %vm684_vm4 = vcmp.eq.s32.totalorder %v2035_v7, 10  ;;  %vm685_vm5 = vcmp.eq.s32.totalorder %v2164_v56, 10 }
  0xc5   : > { %v669_v23 = vsel %vm651_vm3, %v1846_v36, %v635_v20  ;;  %v702_v25 = vsel %vm684_vm4, %v1855_v39, %v668_v22  ;;  %vm718_vm6 = vcmp.eq.s32.totalorder %v2035_v7, 11  ;;  %vm719_vm7 = vcmp.eq.s32.totalorder %v2164_v56, 11 }
  0xc6   : > { %v703_v26 = vsel %vm685_vm5, %v1855_v39, %v669_v23  ;;  %v736_v28 = vsel %vm718_vm6, %v1864_v42, %v702_v25  ;;  %vm752_vm8 = vcmp.eq.s32.totalorder %v2035_v7, 12  ;;  %vm753_vm9 = vcmp.eq.s32.totalorder %v2164_v56, 12 }
  0xc7   : > { %v737_v29 = vsel %vm719_vm7, %v1864_v42, %v703_v26  ;;  %v770_v2 = vsel %vm752_vm8, %v1869_v45, %v736_v28  ;;  %vm786_vm10 = vcmp.eq.s32.totalorder %v2035_v7, 13  ;;  %vm787_vm11 = vcmp.eq.s32.totalorder %v2164_v56, 13 }
  0xc8   : > { %v771_v34 = vsel %vm753_vm9, %v1869_v45, %v737_v29  ;;  %v804_v35 = vsel %vm786_vm10, %v1875_v48, %v770_v2  ;;  %vm820_vm12 = vcmp.eq.s32.totalorder %v2035_v7, 14  ;;  %vm821_vm13 = vcmp.eq.s32.totalorder %v2164_v56, 14 }
  0xc9   : > { %v805_v37 = vsel %vm787_vm11, %v1875_v48, %v771_v34  ;;  %v838_v38 = vsel %vm820_vm12, %v1881_v51, %v804_v35  ;;  %vm854_vm14 = vcmp.eq.s32.totalorder %v2035_v7, 15  ;;  %vm855_vm15 = vcmp.eq.s32.totalorder %v2164_v56, 15 }
  0xca   : > { %v839_v40 = vsel %vm821_vm13, %v1881_v51, %v805_v37  ;;  %v872_v41 = vsel %vm854_vm14, %v1885_v52, %v838_v38  ;;  %v2232_v43 = vunpack.c.2.s8 %v320_v8  ;;  %v2234_v44 = vunpack.c.3.s8 %v320_v8 }
  0xcb   : > { %v873_v46 = vsel %vm855_vm15, %v1885_v52, %v839_v40  ;;  %v2237_v5 = vunpack.c.0.s8 %v320_v8  ;;  %v2239_v6 = vunpack.c.1.s8 %v320_v8 }
  0xcc   : > { %v889_v47 = vpack.c.bf16 %v873_v46, %v872_v41  ;;  %vm342_vm0 = vcmp.eq.s32.totalorder %v2232_v43, 0  ;;  %vm343_vm1 = vcmp.eq.s32.totalorder %v2234_v44, 0  ;;  %vm376_vm2 = vcmp.eq.s32.totalorder %v2232_v43, 1 }
  0xcd   : > { %v360_v7 = vsel %vm342_vm0, %v1762_v9, 0.0  ;;  %v361_v49 = vsel %vm343_vm1, %v1762_v9, 0.0  ;;  %vm377_vm3 = vcmp.eq.s32.totalorder %v2234_v44, 1  ;;  %vm410_vm4 = vcmp.eq.s32.totalorder %v2232_v43, 2 }
  0xce   : > { %900 = vmatpush.bf16.msra.mxu0 %v889_v47  ;;  %v394_v50 = vsel %vm376_vm2, %v1773_v12, %v360_v7  ;;  %v395_v53 = vsel %vm377_vm3, %v1773_v12, %v361_v49  ;;  %vm411_vm5 = vcmp.eq.s32.totalorder %v2234_v44, 2  ;;  %vm444_vm6 = vcmp.eq.s32.totalorder %v2232_v43, 3 }
  0xcf   : > { %v428_v54 = vsel %vm410_vm4, %v1783_v15, %v394_v50  ;;  %v429_v55 = vsel %vm411_vm5, %v1783_v15, %v395_v53  ;;  %vm445_vm7 = vcmp.eq.s32.totalorder %v2234_v44, 3  ;;  %vm478_vm8 = vcmp.eq.s32.totalorder %v2232_v43, 4 }
  0xd0   : > { %v462_v56 = vsel %vm444_vm6, %v1792_v18, %v428_v54  ;;  %v463_v57 = vsel %vm445_vm7, %v1792_v18, %v429_v55  ;;  %vm479_vm9 = vcmp.eq.s32.totalorder %v2234_v44, 4  ;;  %vm512_vm10 = vcmp.eq.s32.totalorder %v2232_v43, 5 }
  0xd1   : > { %v496_v58 = vsel %vm478_vm8, %v1801_v21, %v462_v56  ;;  %v497_v59 = vsel %vm479_vm9, %v1801_v21, %v463_v57  ;;  %vm513_vm11 = vcmp.eq.s32.totalorder %v2234_v44, 5  ;;  %vm546_vm12 = vcmp.eq.s32.totalorder %v2232_v43, 6 }
  0xd2   : > { %v530_v31 = vsel %vm512_vm10, %v1810_v24, %v496_v58  ;;  %v531_v32 = vsel %vm513_vm11, %v1810_v24, %v497_v59  ;;  %vm547_vm13 = vcmp.eq.s32.totalorder %v2234_v44, 6  ;;  %vm580_vm14 = vcmp.eq.s32.totalorder %v2232_v43, 7  ;;  %v884_v58 = vld [vmem:[#allocation2] sm:$0xff] }
  0xd3   : > { %v564_v19 = vsel %vm546_vm12, %v1819_v27, %v530_v31  ;;  %v565_v60 = vsel %vm547_vm13, %v1819_v27, %v531_v32  ;;  %vm581_vm15 = vcmp.eq.s32.totalorder %v2234_v44, 7  ;;  %vm614_vm0 = vcmp.eq.s32.totalorder %v2232_v43, 8 }
  0xd4   : > { %v598_v61 = vsel %vm580_vm14, %v1828_v30, %v564_v19  ;;  %v599_v62 = vsel %vm581_vm15, %v1828_v30, %v565_v60  ;;  %vm615_vm1 = vcmp.eq.s32.totalorder %v2234_v44, 8  ;;  %vm648_vm2 = vcmp.eq.s32.totalorder %v2232_v43, 9 }
  0xd5   : > { %v632_v63 = vsel %vm614_vm0, %v1837_v33, %v598_v61  ;;  %v633_v0 = vsel %vm615_vm1, %v1837_v33, %v599_v62  ;;  %vm649_vm3 = vcmp.eq.s32.totalorder %v2234_v44, 9  ;;  %vm682_vm4 = vcmp.eq.s32.totalorder %v2232_v43, 10 }
  0xd6   : > { %v666_v1 = vsel %vm648_vm2, %v1846_v36, %v632_v63  ;;  %v667_v3 = vsel %vm649_vm3, %v1846_v36, %v633_v0  ;;  %vm683_vm5 = vcmp.eq.s32.totalorder %v2234_v44, 10  ;;  %vm716_vm6 = vcmp.eq.s32.totalorder %v2232_v43, 11 }
  0xd7   : > { %v700_v4 = vsel %vm682_vm4, %v1855_v39, %v666_v1  ;;  %v701_v10 = vsel %vm683_vm5, %v1855_v39, %v667_v3  ;;  %vm717_vm7 = vcmp.eq.s32.totalorder %v2234_v44, 11  ;;  %vm750_vm8 = vcmp.eq.s32.totalorder %v2232_v43, 12 }
  0xd8   : > { %v734_v11 = vsel %vm716_vm6, %v1864_v42, %v700_v4  ;;  %v735_v13 = vsel %vm717_vm7, %v1864_v42, %v701_v10  ;;  %vm751_vm9 = vcmp.eq.s32.totalorder %v2234_v44, 12  ;;  %vm784_vm10 = vcmp.eq.s32.totalorder %v2232_v43, 13 }
  0xd9   : > { %v768_v14 = vsel %vm750_vm8, %v1869_v45, %v734_v11  ;;  %v769_v16 = vsel %vm751_vm9, %v1869_v45, %v735_v13  ;;  %vm785_vm11 = vcmp.eq.s32.totalorder %v2234_v44, 13  ;;  %vm818_vm12 = vcmp.eq.s32.totalorder %v2232_v43, 14 }
  0xda   : > { %v802_v17 = vsel %vm784_vm10, %v1875_v48, %v768_v14  ;;  %v803_v20 = vsel %vm785_vm11, %v1875_v48, %v769_v16  ;;  %vm819_vm13 = vcmp.eq.s32.totalorder %v2234_v44, 14  ;;  %vm852_vm14 = vcmp.eq.s32.totalorder %v2232_v43, 15 }
  0xdb   : > { %v836_v22 = vsel %vm818_vm12, %v1881_v51, %v802_v17  ;;  %v837_v23 = vsel %vm819_vm13, %v1881_v51, %v803_v20  ;;  %vm853_vm15 = vcmp.eq.s32.totalorder %v2234_v44, 15  ;;  %vm340_vm0 = vcmp.eq.s32.totalorder %v2237_v5, 0 }
  0xdc   : > { %v870_v25 = vsel %vm852_vm14, %v1885_v52, %v836_v22  ;;  %v871_v26 = vsel %vm853_vm15, %v1885_v52, %v837_v23  ;;  %vm341_vm1 = vcmp.eq.s32.totalorder %v2239_v6, 0  ;;  %v358_v28 = vsel %vm340_vm0, %v1762_v9, 0.0 }
  0xdd   : > { %v888_v29 = vpack.c.bf16 %v871_v26, %v870_v25  ;;  %v359_v2 = vsel %vm341_vm1, %v1762_v9, 0.0  ;;  %vm374_vm2 = vcmp.eq.s32.totalorder %v2237_v5, 1  ;;  %vm375_vm3 = vcmp.eq.s32.totalorder %v2239_v6, 1 }
  0xde   : > { %v392_v8 = vsel %vm374_vm2, %v1773_v12, %v358_v28  ;;  %v393_v34 = vsel %vm375_vm3, %v1773_v12, %v359_v2  ;;  %vm408_vm4 = vcmp.eq.s32.totalorder %v2237_v5, 2  ;;  %vm409_vm5 = vcmp.eq.s32.totalorder %v2239_v6, 2 }
  0xdf   : > { %901 = vmatpush.bf16.msra.mxu0 %v888_v29  ;;  %v426_v35 = vsel %vm408_vm4, %v1783_v15, %v392_v8  ;;  %v427_v37 = vsel %vm409_vm5, %v1783_v15, %v393_v34  ;;  %vm442_vm6 = vcmp.eq.s32.totalorder %v2237_v5, 3  ;;  %vm443_vm7 = vcmp.eq.s32.totalorder %v2239_v6, 3 }
  0xe0   : > { %v460_v9 = vsel %vm442_vm6, %v1792_v18, %v426_v35  ;;  %v461_v38 = vsel %vm443_vm7, %v1792_v18, %v427_v37  ;;  %vm476_vm8 = vcmp.eq.s32.totalorder %v2237_v5, 4  ;;  %vm477_vm9 = vcmp.eq.s32.totalorder %v2239_v6, 4 }
  0xe1   : > { %v494_v12 = vsel %vm476_vm8, %v1801_v21, %v460_v9  ;;  %v495_v40 = vsel %vm477_vm9, %v1801_v21, %v461_v38  ;;  %vm510_vm10 = vcmp.eq.s32.totalorder %v2237_v5, 5  ;;  %vm511_vm11 = vcmp.eq.s32.totalorder %v2239_v6, 5 }
  0xe2   : > { %v528_v15 = vsel %vm510_vm10, %v1810_v24, %v494_v12  ;;  %v529_v41 = vsel %vm511_vm11, %v1810_v24, %v495_v40  ;;  %vm544_vm12 = vcmp.eq.s32.totalorder %v2237_v5, 6  ;;  %vm545_vm13 = vcmp.eq.s32.totalorder %v2239_v6, 6 }
  0xe3   : > { %v562_v18 = vsel %vm544_vm12, %v1819_v27, %v528_v15  ;;  %v563_v43 = vsel %vm545_vm13, %v1819_v27, %v529_v41  ;;  %vm578_vm14 = vcmp.eq.s32.totalorder %v2237_v5, 7  ;;  %vm579_vm15 = vcmp.eq.s32.totalorder %v2239_v6, 7 }
  0xe4   : > { %v596_v21 = vsel %vm578_vm14, %v1828_v30, %v562_v18  ;;  %v597_v44 = vsel %vm579_vm15, %v1828_v30, %v563_v43  ;;  %vm612_vm0 = vcmp.eq.s32.totalorder %v2237_v5, 8  ;;  %vm613_vm1 = vcmp.eq.s32.totalorder %v2239_v6, 8 }
  0xe5   : > { %v630_v24 = vsel %vm612_vm0, %v1837_v33, %v596_v21  ;;  %v631_v46 = vsel %vm613_vm1, %v1837_v33, %v597_v44  ;;  %vm646_vm2 = vcmp.eq.s32.totalorder %v2237_v5, 9  ;;  %vm647_vm3 = vcmp.eq.s32.totalorder %v2239_v6, 9 }
  0xe6   : > { %v664_v27 = vsel %vm646_vm2, %v1846_v36, %v630_v24  ;;  %v665_v47 = vsel %vm647_vm3, %v1846_v36, %v631_v46  ;;  %vm680_vm4 = vcmp.eq.s32.totalorder %v2237_v5, 10  ;;  %vm681_vm5 = vcmp.eq.s32.totalorder %v2239_v6, 10 }
  0xe7   : > { %v698_v30 = vsel %vm680_vm4, %v1855_v39, %v664_v27  ;;  %v699_v7 = vsel %vm681_vm5, %v1855_v39, %v665_v47  ;;  %vm714_vm6 = vcmp.eq.s32.totalorder %v2237_v5, 11  ;;  %vm715_vm7 = vcmp.eq.s32.totalorder %v2239_v6, 11 }
  0xe8   : > { %v732_v33 = vsel %vm714_vm6, %v1864_v42, %v698_v30  ;;  %v733_v49 = vsel %vm715_vm7, %v1864_v42, %v699_v7  ;;  %vm748_vm8 = vcmp.eq.s32.totalorder %v2237_v5, 12  ;;  %vm749_vm9 = vcmp.eq.s32.totalorder %v2239_v6, 12 }
  0xe9   : > { %v766_v36 = vsel %vm748_vm8, %v1869_v45, %v732_v33  ;;  %v767_v50 = vsel %vm749_vm9, %v1869_v45, %v733_v49  ;;  %vm782_vm10 = vcmp.eq.s32.totalorder %v2237_v5, 13  ;;  %vm783_vm11 = vcmp.eq.s32.totalorder %v2239_v6, 13  ;;  %v885_v45 = vld [vmem:[%s261_s24] sm:$0xff] }
  0xea   : > { %v800_v39 = vsel %vm782_vm10, %v1875_v48, %v766_v36  ;;  %v801_v53 = vsel %vm783_vm11, %v1875_v48, %v767_v50  ;;  %vm816_vm12 = vcmp.eq.s32.totalorder %v2237_v5, 14  ;;  %vm817_vm13 = vcmp.eq.s32.totalorder %v2239_v6, 14 }
  0xeb   : > { %v834_v42 = vsel %vm816_vm12, %v1881_v51, %v800_v39  ;;  %v835_v54 = vsel %vm817_vm13, %v1881_v51, %v801_v53  ;;  %vm850_vm14 = vcmp.eq.s32.totalorder %v2237_v5, 15  ;;  %vm851_vm15 = vcmp.eq.s32.totalorder %v2239_v6, 15 }
  0xec   : > { %v868_v55 = vsel %vm850_vm14, %v1885_v52, %v834_v42  ;;  %v869_v56 = vsel %vm851_vm15, %v1885_v52, %v835_v54  ;;  %v886_v48 = vpack.c.bf16 %v885_v45, %v885_v45 }
  0xed   : > { %v887_v57 = vpack.c.bf16 %v869_v56, %v868_v55 }
  0xef   : > { %902 = vmatpush.bf16.msra.mxu0 %v887_v57 }
  0xf2   : > { %903 = vmatmul.bf16.vlgmr.msra.gmra.mxu0 %v886_v48 }
 0x16f   : > { %v904_v59 = vpop.f32.mrf.mxu0 }
 0x170   : > { %v908_v31 = vadd.f32 %v904_v59, %v884_v58 }
 0x172   : > { %909 = vst [vmem:[#allocation2] sm:$0xff] %v908_v31 }
 0x173   : > { %913 = sbr.rel (%p1105_p4) target bundleno = 381 (0x17d), region = 56 }
 0x177   : > { %v906_v32 = vpop.f32.mrf.mxu0 }
 0x178   : > { %v1257_v52 = vld [vmem:[%s314_s4] ss:$0 sm:$0xff] }
 0x179   : > { %v914_v51 = vld [vmem:[#allocation2] sm:$0xff] }
 0x17a   : > { %v919_v5 = vadd.f32 %v1257_v52, %v914_v51 }
 0x17c   : > { %920 = vst [vmem:[%s310_s5] sm:$0xff] %v919_v5 }
 0x17d PF: > { %s1107_s10 = sshll.u32 %s1475_s25, 3  ;;  %s2496_s3 = sld [smem:[#allocation30_spill]] }
 0x17e   : > { %s936_s26 = sshll.u32 %s310_s5, 4  ;;  %s922_s13 = scalar_lea.sflag [#allocation5], %s308_s9  ;;  %s937_s26 = int_to_ptr.vmem [resolvable:$true] %s936_s26 }
 0x183   : > { %s934_s23 = scalar_lea.hbm %s2496_s3, %s1107_s10  ;;  %s1353_s11 = scalar_lea.hbm %s2496_s3, 16 }
 0x184   : > { %s938_s0 = sshll.u32 %s934_s23, 4  ;;  %s939_s0 = int_to_ptr.hbm [resolvable:$true] %s938_s0 }
 0x185   : > { %s1347_s4 = sshra.s32 %s939_s0, 4  ;;  %s1348_s4 = int_to_ptr.hbm [resolvable:$true] %s1347_s4 }
 0x186   : > { %s1349_s27 = scalar_lea.hbm %s1348_s4, 8  ;;  %p1354_p12 = scmp.lt.s32.totalorder %s1348_s4, %s2496_s3 }
 0x187   : > { %p1350_p11 = scmp.ne.s32.totalorder %s1348_s4, %s1349_s27  ;;  %p1355_p13 = scmp.lt.s32.totalorder %s1353_s11, %s1349_s27 }
 0x189   : > { %p1351_p5 = pnand %p1350_p11, %p1604_p6  ;;  %p1356_p1 = por %p1355_p13, %p1354_p12 }
 0x18b   : > { %p1352_p9 = pneg %p1351_p5 }
 0x18d   : > { %p1357_p2 = pnand %p1356_p1, %p1352_p9 }
 0x18f   : > { %1360 = shalt.err (!%p1357_p2)
}
 0x190   : > { %1119 = dma.vmem_to_hbm [thread:$0]  (%p1604_p6), %s937_s26, 128, %s939_s0, %s922_s13  }
 0x191 PF: > { %s2497_s9 = sld [smem:[#allocation15_spill]]  ;;  %p1139_p7 = scmp.ge.s32.totalorder %s1487_s28, 2 }
 0x192   : > { %s2498_s12 = sld [smem:[#allocation21_spill]] }
 0x197   : > { %s950_s5 = sand.u32 1, %s2497_s9  }
 0x198   : > { %p2499_p3 = scmp.ne.s32.totalorder %s2498_s12, 0  ;;  %s951_s7 = scalar_lea.sflag [#allocation5], %s950_s5 }
 0x19a   : > { %p1133_p8 = pnand %p1139_p7, %p2499_p3 }
 0x19c   : > { %p1134_p10 = pneg %p1133_p8 }
 0x19e   : > { %1430 = dma.done.wait (%p1134_p10), %s951_s7, 128  }
 0x19f   : > { %1432 = vsyncadd (%p1134_p10), %s951_s7, 4294967168  ;;  %s24_s28 = sadd.s32 1, %s1487_s28   ;;  %s2501_s14 = sld [smem:[#allocation26_spill]] }
 0x1a0   : > { %p2402_p0 = scmp.ge.s32.totalorder %s24_s28, 6   ;;  %s2502_s24 = sld [smem:[#allocation25_spill]] }
 0x1a1   : > { %s2503_s2 = sld [smem:[#allocation16_spill]]  ;;  %s2509_s15 = smov %s1439_s16 }
 0x1a2   : > { %s2504_s23 = sld [smem:[#allocation24_spill]]  ;;  %s2510_s16 = smov %s1443_s17 }
 0x1a3   : > { %s2505_s10 = sld [smem:[#allocation18_spill]]  ;;  %s2512_s18 = smov %s1451_s19 }
 0x1a4   : > { %s2506_s25 = sld [smem:[#allocation19_spill]]  ;;  %s2513_s19 = smov %s1455_s20 }
 0x1a5   : > { %s2507_s26 = sld [smem:[#allocation22_spill]]  ;;  %s2511_s17 = smov %s2501_s14 }
 0x1a6   : > { %s2508_s27 = sld [smem:[#allocation23_spill]]  ;;  %s2514_s20 = smov %s2502_s24 }
 0x1a7   : > { %s2515_s21 = smov %s1463_s22  ;;  %s2516_s22 = smov %s2503_s2 }
 0x1a8   :  { %23 = sbr.rel (!%p2402_p0) target bundleno = 18 (0x12), region = 110 }
 0x1a9   : > { %s2517_s24 = smov %s2505_s10 }
 0x1ad   :  { %957 = vsyncpa [#allocation4], 1 }
 0x1ae   :  { %959 = vsyncpa [#allocation4 + $0x1], 1 }
 0x1af   :  { %960 = vsyncpa [#allocation8], 1 }
 0x1b0   :  { %962 = vsyncpa [#allocation8 + $0x1], 1 }
 0x1b1   :  { %963 = vsyncpa [#allocation5], 1 }
 0x1b2   :  { %965 = vsyncpa [#allocation5 + $0x1], 1 }
 0x1b3   :  { %966 = vsyncpa [#allocation6], 1 }
 0x1b4   :  { %968 = vsyncpa [#allocation6 + $0x1], 1 }

</bundles_post_ra>
